<compile_context>
chip_gen: v6e
topology: v6e:2x2x1
jax: 0.10.0
libtpu: 0.0.40
codegen_flags: <defaults>
</compile_context>

<pallas_src>
import functools

import jax
import jax.numpy as jnp
from jax.experimental import pallas as pl
from jax.experimental.pallas import tpu as pltpu


def _round_up(x, m):
    return (x + m - 1) // m * m


# ----------------------------------------------------------------------------
# Kernel
# ----------------------------------------------------------------------------
def resblock_kernel(x_ref, wc_ref, bc_ref, w2_ref, b2_ref, o_ref, *, h_pad):
    """o = relu(x@W1 + b1) @ W2 + b2 + (x@W3 + b3), with [W1 | W3] fused in wc_ref."""
    # Cast the activation tile to the weight compute dtype (no-op for f32).
    x = x_ref[...].astype(wc_ref.dtype)

    # Fused [fc1 | fc3] matmul: one MXU push, f32 accumulation, fused bias add.
    fused = jnp.dot(x, wc_ref[...], preferred_element_type=jnp.float32) + bc_ref[...]

    # Split at the 128-lane-aligned boundary h_pad (static).
    hidden = jnp.maximum(fused[:, :h_pad], 0.0)     # ReLU(fc1(x))   (f32)
    skip = fused[:, h_pad:]                         # fc3(x)         (f32)

    # fc2 (second MXU push).
    out = jnp.dot(hidden.astype(w2_ref.dtype), w2_ref[...],
                  preferred_element_type=jnp.float32) + b2_ref[...]

    # TODO(synk): nn.Dropout(p=0.1) is identity in eval mode; training-mode
    # stochastic dropout (pltpu.prng_seed / prng_random_bits masking) not implemented.

    o_ref[...] = (out + skip).astype(o_ref.dtype)


# ----------------------------------------------------------------------------
# Sizing helpers (all trace-time Python on static values)
# ----------------------------------------------------------------------------
def _vmem_budget_bytes():
    """~3/4 of physical VMEM: ~48 MiB on v7x, ~96 MiB on v5e/v6e."""
    try:
        cap = int(pltpu.get_tpu_info().vmem_capacity_bytes)
    except Exception:
        cap = 64 << 20          # conservative (v7x-sized) fallback
    return (cap * 3) // 4


def _cap_block_b(d_in, n_fused, h_pad, d_out, x_isz, cmp_isz, out_isz, budget_bytes):
    """Max batch rows per tile that fit the VMEM budget."""
    # Resident weights + biases; the grid pipeline double-buffers them even
    # though their index_map is constant, so count them twice.
    weight_bytes = 2 * ((d_in * n_fused + h_pad * d_out) * cmp_isz
                        + (n_fused + d_out) * 4)
    # Per batch-row bytes: double-buffered x / out tiles + in-kernel
    # intermediates (fused f32 result, relu + cast copy, f32 out, skip, x cast).
    per_row = (2 * d_in * x_isz + 2 * d_out * out_isz
               + (n_fused + h_pad + 2 * d_out) * 4
               + (h_pad + d_in) * cmp_isz)
    avail = budget_bytes - weight_bytes - (2 << 20)   # slack for compiler scratch
    avail = max(avail, 8 * per_row)
    return max(8, (avail // per_row) // 8 * 8)


def _choose_block_b(B, cap_rows, requested):
    bb = 1024 if requested is None else requested
    bb = min(bb, cap_rows)
    # Keep >= 2 grid steps so both v7x TensorCores get work (harmless on 1-TC gens).
    bb = min(bb, _round_up(pl.cdiv(B, 2), 256))
    bb = min(bb, _round_up(B, 8))
    if bb >= 256:
        bb = bb // 256 * 256      # full-width passes through the 256-wide MXU (v6e/v7x)
    else:
        bb = _round_up(bb, 8)
    return max(bb, 8)


# ----------------------------------------------------------------------------
# One-time weight packing (hoisted out of the forward pass)
# ----------------------------------------------------------------------------
def pack_resblock_params(w1, b1, w2, b2, w3, b3, compute_dtype=jnp.float32):
    """Pack [W1 | W3] (hidden zero-padded to a 128-lane-aligned split) and W2.

    Weights are stored in `compute_dtype` (use jnp.bfloat16 to halve HBM traffic
    and lift MXU throughput); biases stay f32 and ride the f32 accumulators.
    Call once at model init; pass the packed arrays to resblock_forward.
    """
    d_in, h = w1.shape
    d_out = w2.shape[1]
    h_pad = _round_up(h, 128)
    n_fused = h_pad + d_out

    wc = jnp.zeros((d_in, n_fused), compute_dtype)
    wc = wc.at[:, :h].set(w1.astype(compute_dtype))
    wc = wc.at[:, h_pad:].set(w3.astype(compute_dtype))

    bc = jnp.zeros((1, n_fused), jnp.float32)
    bc = bc.at[0, :h].set(b1.astype(jnp.float32))
    bc = bc.at[0, h_pad:].set(b3.astype(jnp.float32))

    w2p = jnp.zeros((h_pad, d_out), compute_dtype).at[:h, :].set(w2.astype(compute_dtype))
    b2p = b2.astype(jnp.float32).reshape(1, d_out)

    return {"wc": wc, "bc": bc, "w2": w2p, "b2": b2p}


# ----------------------------------------------------------------------------
# Forward
# ----------------------------------------------------------------------------
@functools.partial(jax.jit, static_argnames=("block_b",))
def resblock_forward(x, wc, bc, w2, b2, block_b=None):
    B, d_in = x.shape
    h_pad, d_out = w2.shape
    n_fused = wc.shape[1]
    assert n_fused == h_pad + d_out
    assert bc.shape == (1, n_fused) and b2.shape == (1, d_out)
    out_dtype = x.dtype

    x_isz = jnp.dtype(x.dtype).itemsize
    cmp_isz = jnp.dtype(wc.dtype).itemsize
    out_isz = jnp.dtype(out_dtype).itemsize

    # --- batch tiling (generation-aware VMEM budget, grid kept >= 2) --------
    budget = _vmem_budget_bytes()
    cap_rows = _cap_block_b(d_in, n_fused, h_pad, d_out, x_isz, cmp_isz, out_isz, budget)
    bb = _choose_block_b(B, cap_rows, block_b)
    grid = (pl.cdiv(B, bb),)       # ragged last tile handled by Pallas masking; no x pad

    # --- cost hint for XLA scheduling ----------------------------------------
    flops = 2 * B * (d_in * n_fused + h_pad * d_out)
    bytes_accessed = (B * d_in * x_isz
                      + (d_in * n_fused + h_pad * d_out) * cmp_isz
                      + (n_fused + d_out) * 4
                      + B * d_out * out_isz)

    return pl.pallas_call(
        functools.partial(resblock_kernel, h_pad=h_pad),
        out_shape=jax.ShapeDtypeStruct((B, d_out), out_dtype),
        grid_spec=pltpu.PrefetchScalarGridSpec(
            num_scalar_prefetch=0,
            grid=grid,
            in_specs=[
                pl.BlockSpec((bb, d_in), lambda i: (i, 0)),        # x tile
                pl.BlockSpec((d_in, n_fused), lambda i: (0, 0)),   # [W1 | W3]
                pl.BlockSpec((1, n_fused), lambda i: (0, 0)),      # [b1 | b3] (f32)
                pl.BlockSpec((h_pad, d_out), lambda i: (0, 0)),    # W2
                pl.BlockSpec((1, d_out), lambda i: (0, 0)),        # b2 (f32)
            ],
            out_specs=pl.BlockSpec((bb, d_out), lambda i: (i, 0)),  # unpadded output
        ),
        compiler_params=pltpu.CompilerParams(
            dimension_semantics=("parallel",),     # batch axis shards across TCs
            vmem_limit_bytes=int(budget),
        ),
        cost_estimate=pl.CostEstimate(
            flops=int(flops),
            transcendentals=0,
            bytes_accessed=int(bytes_accessed),
        ),
    )(x, wc, bc, w2, b2)


# ----------------------------------------------------------------------------
# Reference / test
# ----------------------------------------------------------------------------
def init_linear(key, in_features, out_features, dtype=jnp.float32):
    """nn.Linear-style init: U(-1/sqrt(fan_in), +1/sqrt(fan_in)).
    Weight returned as (in_features, out_features) (transposed vs. PyTorch)."""
    kw, kb = jax.random.split(key)
    bound = 1.0 / jnp.sqrt(jnp.asarray(in_features, dtype))
    w = jax.random.uniform(kw, (in_features, out_features), dtype, -bound, bound)
    b = jax.random.uniform(kb, (out_features,), dtype, -bound, bound)
    return w, b


def resblock_reference(x, w1, b1, w2, b2, w3, b3):
    hp = jax.lax.Precision.HIGHEST
    h = jnp.maximum(jnp.dot(x, w1, precision=hp) + b1, 0.0)
    out = jnp.dot(h, w2, precision=hp) + b2
    return out + (jnp.dot(x, w3, precision=hp) + b3)


if __name__ == "__main__":
    key = jax.random.PRNGKey(0)
    k_x, k1, k2, k3 = jax.random.split(key, 4)

    # Small but tile-exercising shapes: (batch, input_dim) with odd D_out < 128.
    B, input_dim, hidden_dim, output_dim = 512, 64, 128, 32

    x = jax.random.normal(k_x, (B, input_dim), jnp.float32)
    w1, b1 = init_linear(k1, input_dim, hidden_dim)
    w2, b2 = init_linear(k2, hidden_dim, output_dim)
    w3, b3 = init_linear(k3, input_dim, output_dim)

    ref = resblock_reference(x, w1, b1, w2, b2, w3, b3)

    # f32 path --------------------------------------------------------------
    p32 = pack_resblock_params(w1, b1, w2, b2, w3, b3, compute_dtype=jnp.float32)
    out = resblock_forward(x, p32["wc"], p32["bc"], p32["w2"], p32["b2"])
    out = jax.block_until_ready(out)
    assert out.shape == (B, output_dim)
    assert jnp.allclose(out, ref, atol=1e-4, rtol=1e-4), "f32 mismatch vs reference"

    # bf16 path (halves HBM traffic for x / weights; f32 accumulation) -------
    p16 = pack_resblock_params(w1, b1, w2, b2, w3, b3, compute_dtype=jnp.bfloat16)
    out16 = resblock_forward(x.astype(jnp.bfloat16),
                             p16["wc"], p16["bc"], p16["w2"], p16["b2"])
    out16 = jax.block_until_ready(out16)
    assert out16.shape == (B, output_dim)
    assert jnp.allclose(out16.astype(jnp.float32), ref, atol=5e-2, rtol=5e-2), \
        "bf16 mismatch vs reference"

    print("KERNEL_OK")
</pallas_src>

<mosaic_0001>
module attributes {stable_mosaic.version = 11 : i64} {
  func.func @resblock_kernel(%arg0: i32, %arg1: memref<256x64xf32, #tpu.memory_space<vmem>>, %arg2: memref<64x160xf32, #tpu.memory_space<vmem>>, %arg3: memref<1x160xf32, #tpu.memory_space<vmem>>, %arg4: memref<128x32xf32, #tpu.memory_space<vmem>>, %arg5: memref<1x32xf32, #tpu.memory_space<vmem>>, %arg6: memref<256x32xf32, #tpu.memory_space<vmem>>) attributes {dimension_semantics = [#tpu.dimension_semantics<parallel>], iteration_bounds = array<i64: 2>, scalar_prefetch = 0 : i64, scratch_operands = 0 : i64, tpu.core_type = #tpu.core_type<tc>, window_params = [{transform_indices = @transform_0, window_bounds = array<i64: 256, 64>}, {pipeline_mode = #tpu.pipeline_mode<synchronous>, transform_indices = @transform_1, window_bounds = array<i64: 64, 160>}, {pipeline_mode = #tpu.pipeline_mode<synchronous>, transform_indices = @transform_2, window_bounds = array<i64: 1, 160>}, {pipeline_mode = #tpu.pipeline_mode<synchronous>, transform_indices = @transform_3, window_bounds = array<i64: 128, 32>}, {pipeline_mode = #tpu.pipeline_mode<synchronous>, transform_indices = @transform_4, window_bounds = array<i64: 1, 32>}, {transform_indices = @transform_5, window_bounds = array<i64: 256, 32>}]} {
    %c0 = arith.constant 0 : index
    %c0_0 = arith.constant 0 : index
    %0 = vector.load %arg1[%c0, %c0_0] : memref<256x64xf32, #tpu.memory_space<vmem>>, vector<256x64xf32>
    %c0_1 = arith.constant 0 : index
    %c0_2 = arith.constant 0 : index
    %1 = vector.load %arg2[%c0_1, %c0_2] : memref<64x160xf32, #tpu.memory_space<vmem>>, vector<64x160xf32>
    %cst = arith.constant dense<0.000000e+00> : vector<256x160xf32>
    %2 = tpu.matmul %0, %1, %cst {dimension_numbers = #tpu.dot_dimension_numbers<[1], [0], [0], [1], [0, 0, 1, 1], [], []>} : vector<256x64xf32>, vector<64x160xf32>, vector<256x160xf32> -> vector<256x160xf32>
    %c0_3 = arith.constant 0 : index
    %c0_4 = arith.constant 0 : index
    %3 = vector.load %arg3[%c0_3, %c0_4] : memref<1x160xf32, #tpu.memory_space<vmem>>, vector<1x160xf32>
    %4 = vector.broadcast %3 : vector<1x160xf32> to vector<256x160xf32>
    %5 = arith.addf %2, %4 : vector<256x160xf32>
    %6 = vector.extract_strided_slice %5 {offsets = [0, 0], sizes = [256, 128], strides = [1, 1]} : vector<256x160xf32> to vector<256x128xf32>
    %cst_5 = arith.constant 0.000000e+00 : f32
    %7 = vector.broadcast %cst_5 : f32 to vector<256x128xf32>
    %8 = arith.maximumf %6, %7 : vector<256x128xf32>
    %9 = vector.extract_strided_slice %5 {offsets = [0, 128], sizes = [256, 32], strides = [1, 1]} : vector<256x160xf32> to vector<256x32xf32>
    %c0_6 = arith.constant 0 : index
    %c0_7 = arith.constant 0 : index
    %10 = vector.load %arg4[%c0_6, %c0_7] : memref<128x32xf32, #tpu.memory_space<vmem>>, vector<128x32xf32>
    %cst_8 = arith.constant dense<0.000000e+00> : vector<256x32xf32>
    %11 = tpu.matmul %8, %10, %cst_8 {dimension_numbers = #tpu.dot_dimension_numbers<[1], [0], [0], [1], [0, 0, 1, 1], [], []>} : vector<256x128xf32>, vector<128x32xf32>, vector<256x32xf32> -> vector<256x32xf32>
    %c0_9 = arith.constant 0 : index
    %c0_10 = arith.constant 0 : index
    %12 = vector.load %arg5[%c0_9, %c0_10] : memref<1x32xf32, #tpu.memory_space<vmem>>, vector<1x32xf32>
    %13 = vector.broadcast %12 : vector<1x32xf32> to vector<256x32xf32>
    %14 = arith.addf %11, %13 : vector<256x32xf32>
    %15 = arith.addf %14, %9 : vector<256x32xf32>
    %c0_11 = arith.constant 0 : index
    %c0_12 = arith.constant 0 : index
    %16 = vector.load %arg6[%c0_11, %c0_12] : memref<256x32xf32, #tpu.memory_space<vmem>>, vector<256x32xf32>
    tpu.vector_store %arg6[%c0_11, %c0_12], %15 {strides = array<i32>} : memref<256x32xf32, #tpu.memory_space<vmem>>, vector<256x32xf32>,
    return
  }
  func.func @transform_0(%arg0: i32) -> (i32, i32) {
    %c0_i32 = arith.constant 0 : i32
    %c0_i32_0 = arith.constant 0 : i32
    return %arg0, %c0_i32 : i32, i32
  }
  func.func @transform_1(%arg0: i32) -> (i32, i32) {
    %c0_i32 = arith.constant 0 : i32
    %c0_i32_0 = arith.constant 0 : i32
    %c0_i32_1 = arith.constant 0 : i32
    return %c0_i32, %c0_i32_0 : i32, i32
  }
  func.func @transform_2(%arg0: i32) -> (i32, i32) {
    %c0_i32 = arith.constant 0 : i32
    %c0_i32_0 = arith.constant 0 : i32
    %c0_i32_1 = arith.constant 0 : i32
    return %c0_i32, %c0_i32_0 : i32, i32
  }
  func.func @transform_3(%arg0: i32) -> (i32, i32) {
    %c0_i32 = arith.constant 0 : i32
    %c0_i32_0 = arith.constant 0 : i32
    %c0_i32_1 = arith.constant 0 : i32
    return %c0_i32, %c0_i32_0 : i32, i32
  }
  func.func @transform_4(%arg0: i32) -> (i32, i32) {
    %c0_i32 = arith.constant 0 : i32
    %c0_i32_0 = arith.constant 0 : i32
    %c0_i32_1 = arith.constant 0 : i32
    return %c0_i32, %c0_i32_0 : i32, i32
  }
  func.func @transform_5(%arg0: i32) -> (i32, i32) {
    %c0_i32 = arith.constant 0 : i32
    %c0_i32_0 = arith.constant 0 : i32
    return %arg0, %c0_i32 : i32, i32
  }
}

</mosaic_0001>

<bundles_post_ra>
// kernel: resblock_forward.1
= control target key start
LH: loop header
LB: loop body
LE: loop exit
PB: predicated region body
PF: predicated region fallthrough
CT: control target
= control target key end

     0   :  { %s1279_s18 = smov 0   ;;  %s1775_s0 = inlined_call_operand.vmem [shape: f32[512,64], index: 0, kind: input, shape index: {}]   ;;  %s1776_s1 = inlined_call_operand.vmem [shape: f32[64,160], index: 1, kind: input, shape index: {}]   ;;  %s1777_s2 = inlined_call_operand.vmem [shape: f32[1,160], index: 2, kind: input, shape index: {}]   ;;  %s1778_s3 = inlined_call_operand.vmem [shape: f32[128,32], index: 3, kind: input, shape index: {}]   ;;  %s1779_s4 = inlined_call_operand.vmem [shape: f32[1,32], index: 4, kind: input, shape index: {}]   ;;  %s1780_s5 = inlined_call_operand.vmem [shape: f32[512,32], index: 5, kind: output, shape index: {}]  }
   0x1 LB: > { %s1043_s19 = sadd.s32 4294967295, %s1246_s18   ;;  %p1047_p0 = scmp.ge.s32.totalorder %s1246_s18, 1  ;;  %s1246_s18 = sphi %s1279_s18, %s15_s18  }
   0x2   : > { %p188_p1 = scmp.lt.s32.totalorder %s1246_s18, 3 }
   0x4   : > { %p189_p2 = pnand %p1047_p0, %p188_p1 }
   0x5   : > { %s1048_s26 = sshll.u32 (!%p189_p2), %s1043_s19, 5 }
   0x6   : > { %192 = sbr.rel (%p189_p2) target bundleno = 533 (0x215), region = 40  ;;  %p217_p3 = scmp.lt.s32.totalorder (!%p189_p2), %s1048_s26, 63 }
   0xb   : > { %v275_v0 = vld [vmem:[%s1776_s1 + $0x78] sm:$0xff]  ;;  %v274_v1 = vld [vmem:[%s1776_s1 + $0x70] sm:$0xff]  ;;  %v273_v2 = vld [vmem:[%s1776_s1 + $0x68] sm:$0xff]  ;;  %v1248_v4 = vmov 0.0   ;;  %s1782_s26 = smov (!%p217_p3, %s1048_s26), 63  ;;  %vm288_vm0 = vcmask 523264  }
   0xc   : > { %401 = vmatprep.subr.mxu0 %v275_v0  ;;  %v272_v3 = vld [vmem:[%s1776_s1 + $0x60] sm:$0xff]  ;;  %449 = vmatprep.mubr.f32.mxu0 %v1248_v4  ;;  %v271_v5 = vld [vmem:[%s1776_s1 + $0x58] sm:$0xff]  ;;  %v270_v6 = vld [vmem:[%s1776_s1 + $0x50] sm:$0xff]  ;;  %s1049_s19 = sshll.u32 %s1782_s26, 3  ;;  %vm954_vm1 = vcmask 261120  }
   0xd   : > { %402 = vmatpush1.msra.mxu0 %v274_v1  ;;  %1215 = vmatprep.subr.mxu1 %v275_v0  ;;  %v269_v7 = vld [vmem:[%s1776_s1 + $0x48] sm:$0xff]  ;;  %v268_v8 = vld [vmem:[%s1776_s1 + $0x40] sm:$0xff]  ;;  %v267_v9 = vld [vmem:[%s1776_s1 + $0x38] sm:$0xff]  ;;  %s1338_s29 = scalar_lea.vmem %s1775_s0, %s1049_s19  ;;  %s1614_s28 = scalar_lea.vmem %s1780_s5, %s1049_s19 }
   0xe   : > { %403 = vmatprep.subr.mxu0 %v273_v2  ;;  %1223 = vmatpush1.msra.mxu1 %v274_v1  ;;  %v266_v10 = vld [vmem:[%s1776_s1 + $0x30] sm:$0xff]  ;;  %v265_v11 = vld [vmem:[%s1776_s1 + $0x28] sm:$0xff]  ;;  %v264_v12 = vld [vmem:[%s1776_s1 + $0x20] sm:$0xff]  ;;  %v278_v1 = vlaneseq }
   0xf   : > { %404 = vmatpush1.msra.mxu0 %v272_v3  ;;  %1216 = vmatprep.subr.mxu1 %v273_v2  ;;  %v263_v13 = vld [vmem:[%s1776_s1 + $0x18] sm:$0xff]  ;;  %v262_v14 = vld [vmem:[%s1776_s1 + $0x10] sm:$0xff]  ;;  %v261_v15 = vld [vmem:[%s1776_s1 + $0x8] sm:$0xff] }
  0x10   : > { %405 = vmatprep.subr.mxu0 %v271_v5  ;;  %1224 = vmatpush1.msra.mxu1 %v272_v3  ;;  %v260_v16 = vld [vmem:[%s1776_s1] sm:$0xff]  ;;  %v689_v19 = vld [vmem:[%s1778_s3 + $0x78] sm:$0xff]  ;;  %v229_v20 = vld [vmem:[%s1338_s29 + $0x8] sm:$0xff]  ;;  %v1489_v2 = vshrl.u32 %v278_v1, 7 }
  0x11   : > { %406 = vmatpush1.msra.mxu0 %v270_v6  ;;  %1217 = vmatprep.subr.mxu1 %v271_v5  ;;  %v228_v17 = vld [vmem:[%s1338_s29] sm:$0xff]  ;;  %v688_v21 = vld [vmem:[%s1778_s3 + $0x70] sm:$0xff]  ;;  %v253_v22 = vld [vmem:[%s1338_s29 + $0xc8] sm:$0xff] }
  0x12   : > { %407 = vmatprep.subr.mxu0 %v269_v7  ;;  %1225 = vmatpush1.msra.mxu1 %v270_v6  ;;  %v252_v18 = vld [vmem:[%s1338_s29 + $0xc0] sm:$0xff]  ;;  %v687_v23 = vld [vmem:[%s1778_s3 + $0x68] sm:$0xff]  ;;  %v230_v24 = vld [vmem:[%s1338_s29 + $0x10] sm:$0xff]  ;;  %v280_v3 = vsub.s32 0, %v1489_v2 }
  0x13   : > { %408 = vmatpush1.msra.mxu0 %v268_v8  ;;  %1218 = vmatprep.subr.mxu1 %v269_v7  ;;  %v686_v25 = vld [vmem:[%s1778_s3 + $0x60] sm:$0xff]  ;;  %v254_v26 = vld [vmem:[%s1338_s29 + $0xd0] sm:$0xff]  ;;  %v685_v27 = vld [vmem:[%s1778_s3 + $0x58] sm:$0xff] }
  0x14   : > { %409 = vmatprep.subr.mxu0 %v267_v9  ;;  %1226 = vmatpush1.msra.mxu1 %v268_v8  ;;  %v231_v28 = vld [vmem:[%s1338_s29 + $0x18] sm:$0xff]  ;;  %v684_v29 = vld [vmem:[%s1778_s3 + $0x50] sm:$0xff]  ;;  %v683_v31 = vld [vmem:[%s1778_s3 + $0x48] sm:$0xff] }
  0x15   : > { %410 = vmatpush1.msra.mxu0 %v266_v10  ;;  %1219 = vmatprep.subr.mxu1 %v267_v9  ;;  %v255_v30 = vld [vmem:[%s1338_s29 + $0xd8] sm:$0xff]  ;;  %v232_v32 = vld [vmem:[%s1338_s29 + $0x20] sm:$0xff]  ;;  %v233_v36 = vld [vmem:[%s1338_s29 + $0x28] sm:$0xff] }
  0x16   : > { %411 = vmatprep.subr.mxu0 %v265_v11  ;;  %1227 = vmatpush1.msra.mxu1 %v266_v10  ;;  %v682_v33 = vld [vmem:[%s1778_s3 + $0x40] sm:$0xff]  ;;  %v681_v35 = vld [vmem:[%s1778_s3 + $0x38] sm:$0xff]  ;;  %v680_v37 = vld [vmem:[%s1778_s3 + $0x30] sm:$0xff] }
  0x17   : > { %412 = vmatpush1.msra.mxu0 %v264_v12  ;;  %1220 = vmatprep.subr.mxu1 %v265_v11  ;;  %v256_v34 = vld [vmem:[%s1338_s29 + $0xe0] sm:$0xff]  ;;  %v257_v38 = vld [vmem:[%s1338_s29 + $0xe8] sm:$0xff]  ;;  %v234_v40 = vld [vmem:[%s1338_s29 + $0x30] sm:$0xff] }
  0x18   : > { %413 = vmatprep.subr.mxu0 %v263_v13  ;;  %1228 = vmatpush1.msra.mxu1 %v264_v12  ;;  %v679_v39 = vld [vmem:[%s1778_s3 + $0x28] sm:$0xff]  ;;  %v678_v41 = vld [vmem:[%s1778_s3 + $0x20] sm:$0xff]  ;;  %v258_v42 = vld [vmem:[%s1338_s29 + $0xf0] sm:$0xff] }
  0x19   : > { %414 = vmatpush1.msra.mxu0 %v262_v14  ;;  %1221 = vmatprep.subr.mxu1 %v263_v13  ;;  %v235_v43 = vld [vmem:[%s1338_s29 + $0x38] sm:$0xff]  ;;  %v236_v45 = vld [vmem:[%s1338_s29 + $0x40] sm:$0xff]  ;;  %v237_v46 = vld [vmem:[%s1338_s29 + $0x48] sm:$0xff] }
  0x1a   : > { %415 = vmatprep.subr.mxu0 %v261_v15  ;;  %1229 = vmatpush1.msra.mxu1 %v262_v14  ;;  %v259_v44 = vld [vmem:[%s1338_s29 + $0xf8] sm:$0xff]  ;;  %v238_v47 = vld [vmem:[%s1338_s29 + $0x50] sm:$0xff]  ;;  %v240_v49 = vld [vmem:[%s1338_s29 + $0x60] sm:$0xff] }
  0x1b   : > { %416 = vmatpush1.msra.mxu0 %v260_v16  ;;  %1222 = vmatprep.subr.mxu1 %v261_v15  ;;  %v239_v48 = vld [vmem:[%s1338_s29 + $0x58] sm:$0xff]  ;;  %v241_v50 = vld [vmem:[%s1338_s29 + $0x68] sm:$0xff]  ;;  %v242_v51 = vld [vmem:[%s1338_s29 + $0x70] sm:$0xff] }
  0x1c   : > { %1052 = vmatmul.mubr.msk.f32.vlgmr.msra.gmra.mxu0 %vm288_vm0, %v228_v17  ;;  %1230 = vmatpush1.msra.mxu1 %v260_v16  ;;  %v243_v52 = vld [vmem:[%s1338_s29 + $0x78] sm:$0xff]  ;;  %v244_v53 = vld [vmem:[%s1338_s29 + $0x80] sm:$0xff]  ;;  %v245_v55 = vld [vmem:[%s1338_s29 + $0x88] sm:$0xff] }
  0x1d   : > { %455 = vmatprep.mubr.f32.mxu0 %v1248_v4  ;;  %593 = vmatprep.mubr.f32.mxu1 %v1248_v4  ;;  %v677_v54 = vld [vmem:[%s1778_s3 + $0x18] sm:$0xff]  ;;  %v676_v56 = vld [vmem:[%s1778_s3 + $0x10] sm:$0xff]  ;;  %v675_v57 = vld [vmem:[%s1778_s3 + $0x8] sm:$0xff] }
  0x1e   : > { %1076 = vmatmul.mubr.msk.f32.vlgmr.msra.gmra.mxu1 %vm288_vm0, %v252_v18  ;;  %1135 = vmatprep.subr.mxu1 %v689_v19  ;;  %v246_v58 = vld [vmem:[%s1338_s29 + $0x90] sm:$0xff]  ;;  %v674_v59 = vld [vmem:[%s1778_s3] sm:$0xff]  ;;  %v247_v60 = vld [vmem:[%s1338_s29 + $0x98] sm:$0xff] }
  0x1f   : > { %599 = vmatprep.mubr.f32.mxu1 %v1248_v4  ;;  %1136 = vmatpush3.msra.mxu1 %v689_v19  ;;  %v248_v61 = vld [vmem:[%s1338_s29 + $0xa0] sm:$0xff]  ;;  %v249_v62 = vld [vmem:[%s1338_s29 + $0xa8] sm:$0xff]  ;;  %v250_v63 = vld [vmem:[%s1338_s29 + $0xb0] sm:$0xff] }
  0x20   : > { %1053 = vmatmul.mubr.msk.f32.gmra.mxu0 %vm288_vm0, %v229_v20  ;;  %1137 = vmatprep.subr.mxu1 %v688_v21  ;;  %v251_v0 = vld [vmem:[%s1338_s29 + $0xb8] sm:$0xff]  ;;  %v1495_v5 = vld [vmem:[%s1777_s2] sm:$0x3] }
  0x21   : > { %461 = vmatprep.mubr.f32.mxu0 %v1248_v4  ;;  %1138 = vmatpush3.msra.mxu1 %v688_v21  ;;  %v1498_v6 = vrot.slane %v1495_v5, %v280_v3 }
  0x22   : > { %1077 = vmatmul.mubr.msk.f32.gmra.mxu1 %vm288_vm0, %v253_v22  ;;  %1139 = vmatprep.subr.mxu1 %v687_v23 }
  0x23   : > { %605 = vmatprep.mubr.f32.mxu1 %v1248_v4  ;;  %1140 = vmatpush3.msra.mxu1 %v687_v23 }
  0x24   : > { %1054 = vmatmul.mubr.msk.f32.gmra.mxu0 %vm288_vm0, %v230_v24  ;;  %1141 = vmatprep.subr.mxu1 %v686_v25 }
  0x25   : > { %467 = vmatprep.mubr.f32.mxu0 %v1248_v4  ;;  %1142 = vmatpush3.msra.mxu1 %v686_v25 }
  0x26   : > { %1078 = vmatmul.mubr.msk.f32.gmra.mxu1 %vm288_vm0, %v254_v26  ;;  %1143 = vmatprep.subr.mxu1 %v685_v27 }
  0x27   : > { %611 = vmatprep.mubr.f32.mxu1 %v1248_v4  ;;  %1144 = vmatpush3.msra.mxu1 %v685_v27 }
  0x28   : > { %1055 = vmatmul.mubr.msk.f32.gmra.mxu0 %vm288_vm0, %v231_v28  ;;  %1145 = vmatprep.subr.mxu1 %v684_v29 }
  0x29   : > { %473 = vmatprep.mubr.f32.mxu0 %v1248_v4  ;;  %1146 = vmatpush3.msra.mxu1 %v684_v29 }
  0x2a   : > { %1079 = vmatmul.mubr.msk.f32.gmra.mxu1 %vm288_vm0, %v255_v30  ;;  %1147 = vmatprep.subr.mxu1 %v683_v31 }
  0x2b   : > { %617 = vmatprep.mubr.f32.mxu1 %v1248_v4  ;;  %1148 = vmatpush3.msra.mxu1 %v683_v31 }
  0x2c   : > { %1056 = vmatmul.mubr.msk.f32.gmra.mxu0 %vm288_vm0, %v232_v32  ;;  %1149 = vmatprep.subr.mxu1 %v682_v33 }
  0x2d   : > { %479 = vmatprep.mubr.f32.mxu0 %v1248_v4  ;;  %1150 = vmatpush3.msra.mxu1 %v682_v33 }
  0x2e   : > { %1080 = vmatmul.mubr.msk.f32.gmra.mxu1 %vm288_vm0, %v256_v34  ;;  %1151 = vmatprep.subr.mxu1 %v681_v35 }
  0x2f   : > { %623 = vmatprep.mubr.f32.mxu1 %v1248_v4  ;;  %1152 = vmatpush3.msra.mxu1 %v681_v35 }
  0x30   : > { %1057 = vmatmul.mubr.msk.f32.gmra.mxu0 %vm288_vm0, %v233_v36  ;;  %1153 = vmatprep.subr.mxu1 %v680_v37 }
  0x31   : > { %485 = vmatprep.mubr.f32.mxu0 %v1248_v4  ;;  %1154 = vmatpush3.msra.mxu1 %v680_v37 }
  0x32   : > { %1081 = vmatmul.mubr.msk.f32.gmra.mxu1 %vm288_vm0, %v257_v38  ;;  %1155 = vmatprep.subr.mxu1 %v679_v39 }
  0x33   : > { %629 = vmatprep.mubr.f32.mxu1 %v1248_v4  ;;  %1156 = vmatpush3.msra.mxu1 %v679_v39 }
  0x34   : > { %1058 = vmatmul.mubr.msk.f32.gmra.mxu0 %vm288_vm0, %v234_v40  ;;  %1157 = vmatprep.subr.mxu1 %v678_v41 }
  0x35   : > { %491 = vmatprep.mubr.f32.mxu0 %v1248_v4  ;;  %1158 = vmatpush3.msra.mxu1 %v678_v41 }
  0x36   : > { %1082 = vmatmul.mubr.msk.f32.gmra.mxu1 %vm288_vm0, %v258_v42  ;;  %1159 = vmatprep.subr.mxu1 %v677_v54 }
  0x37   : > { %635 = vmatprep.mubr.f32.mxu1 %v1248_v4  ;;  %1160 = vmatpush3.msra.mxu1 %v677_v54 }
  0x38   : > { %1059 = vmatmul.mubr.msk.f32.gmra.mxu0 %vm288_vm0, %v235_v43  ;;  %1161 = vmatprep.subr.mxu1 %v676_v56 }
  0x39   : > { %497 = vmatprep.mubr.f32.mxu0 %v1248_v4  ;;  %1162 = vmatpush3.msra.mxu1 %v676_v56 }
  0x3a   : > { %1083 = vmatmul.mubr.msk.f32.gmra.mxu1 %vm288_vm0, %v259_v44  ;;  %1163 = vmatprep.subr.mxu1 %v675_v57 }
  0x3b   : > { %1164 = vmatpush3.msra.mxu1 %v675_v57 }
  0x3c   : > { %1060 = vmatmul.mubr.msk.f32.gmra.mxu0 %vm288_vm0, %v236_v45  ;;  %1165 = vmatprep.subr.mxu1 %v674_v59 }
  0x3d   : > { %503 = vmatprep.mubr.f32.mxu0 %v1248_v4  ;;  %1166 = vmatpush3.msra.mxu1 %v674_v59 }
  0x40   : > { %1061 = vmatmul.mubr.msk.f32.gmra.mxu0 %vm288_vm0, %v237_v46 }
  0x41   : > { %509 = vmatprep.mubr.f32.mxu0 %v1248_v4 }
  0x44   : > { %1062 = vmatmul.mubr.msk.f32.gmra.mxu0 %vm288_vm0, %v238_v47 }
  0x45   : > { %515 = vmatprep.mubr.f32.mxu0 %v1248_v4 }
  0x48   : > { %1063 = vmatmul.mubr.msk.f32.gmra.mxu0 %vm288_vm0, %v239_v48 }
  0x49   : > { %521 = vmatprep.mubr.f32.mxu0 %v1248_v4 }
  0x4c   : > { %1064 = vmatmul.mubr.msk.f32.gmra.mxu0 %vm288_vm0, %v240_v49 }
  0x4d   : > { %527 = vmatprep.mubr.f32.mxu0 %v1248_v4 }
  0x50   : > { %1065 = vmatmul.mubr.msk.f32.gmra.mxu0 %vm288_vm0, %v241_v50 }
  0x51   : > { %533 = vmatprep.mubr.f32.mxu0 %v1248_v4 }
  0x54   : > { %1066 = vmatmul.mubr.msk.f32.gmra.mxu0 %vm288_vm0, %v242_v51 }
  0x55   : > { %539 = vmatprep.mubr.f32.mxu0 %v1248_v4 }
  0x58   : > { %1067 = vmatmul.mubr.msk.f32.gmra.mxu0 %vm288_vm0, %v243_v52 }
  0x59   : > { %545 = vmatprep.mubr.f32.mxu0 %v1248_v4 }
  0x5c   : > { %1068 = vmatmul.mubr.msk.f32.gmra.mxu0 %vm288_vm0, %v244_v53 }
  0x5d   : > { %551 = vmatprep.mubr.f32.mxu0 %v1248_v4 }
  0x60   : > { %1069 = vmatmul.mubr.msk.f32.gmra.mxu0 %vm288_vm0, %v245_v55 }
  0x61   : > { %557 = vmatprep.mubr.f32.mxu0 %v1248_v4 }
  0x64   : > { %1070 = vmatmul.mubr.msk.f32.gmra.mxu0 %vm288_vm0, %v246_v58 }
  0x65   : > { %563 = vmatprep.mubr.f32.mxu0 %v1248_v4 }
  0x68   : > { %1071 = vmatmul.mubr.msk.f32.gmra.mxu0 %vm288_vm0, %v247_v60 }
  0x69   : > { %569 = vmatprep.mubr.f32.mxu0 %v1248_v4 }
  0x6c   : > { %1072 = vmatmul.mubr.msk.f32.gmra.mxu0 %vm288_vm0, %v248_v61 }
  0x6d   : > { %575 = vmatprep.mubr.f32.mxu0 %v1248_v4 }
  0x70   : > { %1073 = vmatmul.mubr.msk.f32.gmra.mxu0 %vm288_vm0, %v249_v62 }
  0x71   : > { %581 = vmatprep.mubr.f32.mxu0 %v1248_v4 }
  0x74   : > { %1074 = vmatmul.mubr.msk.f32.gmra.mxu0 %vm288_vm0, %v250_v63 }
  0x75   : > { %587 = vmatprep.mubr.f32.mxu0 %v1248_v4 }
  0x78   : > { %1075 = vmatmul.mubr.msk.f32.gmra.mxu0 %vm288_vm0, %v251_v0 }
  0xdc   : > { %v451_v7 = vpop.f32.mrf.mxu0 }
  0xdd   : > { %v452_v8 = vadd.f32 %v451_v7, %v1498_v6 }
  0xde   : > { %v1501_v4 = vpop.f32.mrf.mxu0  ;;  %v1536_v55 = vpop.f32.mrf.mxu1 }
  0xdf   : > { %v642_v9 = vmax.f32 %v452_v8, 0.0 }
  0xe0   : > { %v457_v10 = vpop.f32.mrf.mxu0  ;;  %v1541_v60 = vpop.f32.mrf.mxu1 }
  0xe1   : > { %v458_v11 = vadd.f32 %v457_v10, %v1498_v6  ;;  %1167 = vmatprep.mubr.f32.mxu1 %v642_v9 }
  0xe2   : > { %v1504_v12 = vpop.f32.mrf.mxu0  ;;  %v601_v1 = vpop.f32.mrf.mxu1 }
  0xe3   : > { %v643_v13 = vmax.f32 %v458_v11, 0.0 }
  0xe4   : > { %v463_v14 = vpop.f32.mrf.mxu0  ;;  %v1549_v10 = vpop.f32.mrf.mxu1 }
  0xe5   : > { %v464_v15 = vadd.f32 %v463_v14, %v1498_v6  ;;  %1168 = vmatmul.mubr.f32.vlgmr.msra.gmra.mxu1 %v643_v13 }
  0xe6   : > { %v1507_v16 = vpop.f32.mrf.mxu0 }
  0xe7   : > { %v644_v17 = vmax.f32 %v464_v15, 0.0 }
  0xe8   : > { %v469_v18 = vpop.f32.mrf.mxu0 }
  0xe9   : > { %v470_v19 = vadd.f32 %v469_v18, %v1498_v6  ;;  %1170 = vmatprep.mubr.f32.mxu1 %v644_v17  ;;  %v607_v17 = vpop.f32.mrf.mxu1 }
  0xea   : > { %v1510_v20 = vpop.f32.mrf.mxu0 }
  0xeb   : > { %v645_v21 = vmax.f32 %v470_v19, 0.0 }
  0xec   : > { %v475_v22 = vpop.f32.mrf.mxu0 }
  0xed   : > { %v476_v23 = vadd.f32 %v475_v22, %v1498_v6  ;;  %1171 = vmatmul.mubr.f32.gmra.mxu1 %v645_v21 }
  0xee   : > { %v1513_v24 = vpop.f32.mrf.mxu0 }
  0xef   : > { %v646_v25 = vmax.f32 %v476_v23, 0.0  ;;  %v1557_v23 = vpop.f32.mrf.mxu1 }
  0xf0   : > { %v481_v26 = vpop.f32.mrf.mxu0 }
  0xf1   : > { %v482_v27 = vadd.f32 %v481_v26, %v1498_v6  ;;  %1173 = vmatprep.mubr.f32.mxu1 %v646_v25 }
  0xf2   : > { %v1516_v28 = vpop.f32.mrf.mxu0 }
  0xf3   : > { %v647_v29 = vmax.f32 %v482_v27, 0.0 }
  0xf4   : > { %v487_v30 = vpop.f32.mrf.mxu0 }
  0xf5   : > { %v488_v31 = vadd.f32 %v487_v30, %v1498_v6  ;;  %1174 = vmatmul.mubr.f32.gmra.mxu1 %v647_v29  ;;  %v613_v30 = vpop.f32.mrf.mxu1 }
  0xf6   : > { %v1519_v32 = vpop.f32.mrf.mxu0 }
  0xf7   : > { %v648_v33 = vmax.f32 %v488_v31, 0.0 }
  0xf8   : > { %v493_v34 = vpop.f32.mrf.mxu0 }
  0xf9   : > { %v494_v35 = vadd.f32 %v493_v34, %v1498_v6  ;;  %1176 = vmatprep.mubr.f32.mxu1 %v648_v33 }
  0xfa   : > { %v1522_v36 = vpop.f32.mrf.mxu0 }
  0xfb   : > { %v649_v37 = vmax.f32 %v494_v35, 0.0 }
  0xfc   : > { %v499_v38 = vpop.f32.mrf.mxu0 }
  0xfd   : > { %v500_v39 = vadd.f32 %v499_v38, %v1498_v6  ;;  %1177 = vmatmul.mubr.f32.gmra.mxu1 %v649_v37  ;;  %v1565_v37 = vpop.f32.mrf.mxu1 }
  0xfe   : > { %v1525_v40 = vpop.f32.mrf.mxu0 }
  0xff   : > { %v650_v41 = vmax.f32 %v500_v39, 0.0 }
 0x100   : > { %v505_v42 = vpop.f32.mrf.mxu0 }
 0x101   : > { %v506_v43 = vadd.f32 %v505_v42, %v1498_v6  ;;  %1179 = vmatprep.mubr.f32.mxu1 %v650_v41 }
 0x102   : > { %v1528_v44 = vpop.f32.mrf.mxu0 }
 0x103   : > { %v651_v45 = vmax.f32 %v506_v43, 0.0  ;;  %v619_v43 = vpop.f32.mrf.mxu1 }
 0x104   : > { %v511_v46 = vpop.f32.mrf.mxu0 }
 0x105   : > { %v512_v47 = vadd.f32 %v511_v46, %v1498_v6  ;;  %1180 = vmatmul.mubr.f32.gmra.mxu1 %v651_v45 }
 0x106   : > { %v1531_v48 = vpop.f32.mrf.mxu0 }
 0x107   : > { %v652_v49 = vmax.f32 %v512_v47, 0.0 }
 0x108   : > { %v517_v50 = vpop.f32.mrf.mxu0 }
 0x109   : > { %v518_v51 = vadd.f32 %v517_v50, %v1498_v6  ;;  %1182 = vmatprep.mubr.f32.mxu1 %v652_v49  ;;  %v1573_v50 = vpop.f32.mrf.mxu1 }
 0x10a   : > { %v1534_v52 = vpop.f32.mrf.mxu0 }
 0x10b   : > { %v653_v53 = vmax.f32 %v518_v51, 0.0 }
 0x10c   : > { %v523_v54 = vpop.f32.mrf.mxu0 }
 0x10d   : > { %v524_v56 = vadd.f32 %v523_v54, %v1498_v6  ;;  %1183 = vmatmul.mubr.f32.gmra.mxu1 %v653_v53 }
 0x10e   : > { %v1539_v57 = vpop.f32.mrf.mxu0 }
 0x10f   : > { %v654_v58 = vmax.f32 %v524_v56, 0.0 }
 0x110   : > { %v529_v59 = vpop.f32.mrf.mxu0 }
 0x111   : > { %v530_v61 = vadd.f32 %v529_v59, %v1498_v6  ;;  %1185 = vmatprep.mubr.f32.mxu1 %v654_v58  ;;  %v625_v58 = vpop.f32.mrf.mxu1 }
 0x112   : > { %v1544_v62 = vpop.f32.mrf.mxu0 }
 0x113   : > { %v655_v63 = vmax.f32 %v530_v61, 0.0 }
 0x114   : > { %v535_v0 = vpop.f32.mrf.mxu0 }
 0x115   : > { %v536_v3 = vadd.f32 %v535_v0, %v1498_v6  ;;  %1186 = vmatmul.mubr.f32.gmra.mxu1 %v655_v63  ;;  %v596_v0 = vadd.f32 %v1536_v55, %v1498_v6  ;;  %v620_v55 = vadd.f32 %v619_v43, %v1498_v6  ;;  %v284_v43 = vsub.s32 1, %v1489_v2 }
 0x116   : > { %v1547_v7 = vpop.f32.mrf.mxu0 }
 0x117   : > { %v656_v8 = vmax.f32 %v536_v3, 0.0 }
 0x118   : > { %v541_v9 = vpop.f32.mrf.mxu0 }
 0x119   : > { %v542_v11 = vadd.f32 %v541_v9, %v1498_v6  ;;  %1188 = vmatprep.mubr.f32.mxu1 %v656_v8  ;;  %v1583_v8 = vpop.f32.mrf.mxu1 }
 0x11a   : > { %v1552_v13 = vpop.f32.mrf.mxu0 }
 0x11b   : > { %v657_v14 = vmax.f32 %v542_v11, 0.0  ;;  %v602_v11 = vadd.f32 %v601_v1, %v1498_v6 }
 0x11c   : > { %v547_v15 = vpop.f32.mrf.mxu0 }
 0x11d   : > { %v548_v18 = vadd.f32 %v547_v15, %v1498_v6  ;;  %1189 = vmatmul.mubr.f32.gmra.mxu1 %v657_v14  ;;  %v666_v15 = vmax.f32 %v596_v0, 0.0 }
 0x11e   : > { %v1555_v19 = vpop.f32.mrf.mxu0 }
 0x11f   : > { %v658_v21 = vmax.f32 %v548_v18, 0.0  ;;  %v608_v18 = vadd.f32 %v607_v17, %v1498_v6 }
 0x120   : > { %v553_v22 = vpop.f32.mrf.mxu0 }
 0x121   : > { %v554_v25 = vadd.f32 %v553_v22, %v1498_v6  ;;  %1191 = vmatprep.mubr.f32.mxu1 %v658_v21  ;;  %v631_v21 = vpop.f32.mrf.mxu1  ;;  %v667_v22 = vmax.f32 %v602_v11, 0.0 }
 0x122   : > { %v1560_v26 = vpop.f32.mrf.mxu0 }
 0x123   : > { %v659_v27 = vmax.f32 %v554_v25, 0.0  ;;  %v614_v25 = vadd.f32 %v613_v30, %v1498_v6 }
 0x124   : > { %v559_v29 = vpop.f32.mrf.mxu0 }
 0x125   : > { %v560_v31 = vadd.f32 %v559_v29, %v1498_v6  ;;  %1192 = vmatmul.mubr.f32.gmra.mxu1 %v659_v27  ;;  %v668_v27 = vmax.f32 %v608_v18, 0.0  ;;  %v1590_v29 = vpop.f32.mrf.mxu1  ;;  %v669_v1 = vmax.f32 %v614_v25, 0.0 }
 0x126   : > { %v1563_v33 = vpop.f32.mrf.mxu0 }
 0x127   : > { %v660_v34 = vmax.f32 %v560_v31, 0.0  ;;  %v632_v31 = vadd.f32 %v631_v21, %v1498_v6  ;;  %v637_v17 = vpop.f32.mrf.mxu1 }
 0x128   : > { %v565_v35 = vpop.f32.mrf.mxu0 }
 0x129   : > { %v566_v38 = vadd.f32 %v565_v35, %v1498_v6  ;;  %1194 = vmatprep.mubr.f32.mxu1 %v660_v34  ;;  %v626_v34 = vadd.f32 %v625_v58, %v1498_v6  ;;  %v670_v35 = vmax.f32 %v620_v55, 0.0 }
 0x12a   : > { %v1568_v39 = vpop.f32.mrf.mxu0 }
 0x12b   : > { %v661_v41 = vmax.f32 %v566_v38, 0.0  ;;  %v638_v38 = vadd.f32 %v637_v17, %v1498_v6  ;;  %v671_v30 = vmax.f32 %v626_v34, 0.0 }
 0x12c   : > { %v571_v42 = vpop.f32.mrf.mxu0 }
 0x12d   : > { %v572_v45 = vadd.f32 %v571_v42, %v1498_v6  ;;  %1195 = vmatmul.mubr.f32.gmra.mxu1 %v661_v41  ;;  %v672_v41 = vmax.f32 %v632_v31, 0.0  ;;  %v673_v42 = vmax.f32 %v638_v38, 0.0 }
 0x12e   : > { %v1571_v46 = vpop.f32.mrf.mxu0 }
 0x12f   : > { %v662_v47 = vmax.f32 %v572_v45, 0.0  ;;  %v1596_v45 = vpop.f32.mrf.mxu1 }
 0x130   : > { %v577_v49 = vpop.f32.mrf.mxu0 }
 0x131   : > { %v578_v51 = vadd.f32 %v577_v49, %v1498_v6  ;;  %1197 = vmatprep.mubr.f32.mxu1 %v662_v47  ;;  %v1601_v47 = vld [vmem:[%s1779_s4] ss:$0 sm:$0xff]  ;;  %v1604_v49 = vrot.slane %v1495_v5, %v284_v43 }
 0x132   : > { %v1576_v53 = vpop.f32.mrf.mxu0 }
 0x133   : > { %v663_v54 = vmax.f32 %v578_v51, 0.0  ;;  %v460_v51 = vadd.f32 %v1504_v12, %v1604_v49  ;;  %v454_v5 = vadd.f32 %v1501_v4, %v1604_v49  ;;  %v466_v4 = vadd.f32 %v1507_v16, %v1604_v49 }
 0x134   : > { %v583_v56 = vpop.f32.mrf.mxu0  ;;  %v478_v16 = vadd.f32 %v1513_v24, %v1604_v49  ;;  %v490_v24 = vadd.f32 %v1519_v32, %v1604_v49  ;;  %v502_v32 = vadd.f32 %v1525_v40, %v1604_v49  ;;  %v514_v40 = vadd.f32 %v1531_v48, %v1604_v49 }
 0x135   : > { %v584_v59 = vadd.f32 %v583_v56, %v1498_v6  ;;  %1198 = vmatmul.mubr.f32.gmra.mxu1 %v663_v54  ;;  %v526_v48 = vadd.f32 %v1539_v57, %v1604_v49  ;;  %v538_v57 = vadd.f32 %v1547_v7, %v1604_v49  ;;  %v550_v7 = vadd.f32 %v1555_v19, %v1604_v49 }
 0x136   : > { %v1579_v61 = vpop.f32.mrf.mxu0 }
 0x137   : > { %v664_v63 = vmax.f32 %v584_v59, 0.0 }
 0x138   : > { %v589_v3 = vpop.f32.mrf.mxu0 }
 0x139   : > { %v590_v9 = vadd.f32 %v589_v3, %v1498_v6  ;;  %1200 = vmatprep.mubr.f32.mxu1 %v664_v63  ;;  %v472_v63 = vadd.f32 %v1510_v20, %v1604_v49  ;;  %v484_v20 = vadd.f32 %v1516_v28, %v1604_v49  ;;  %v496_v28 = vadd.f32 %v1522_v36, %v1604_v49 }
 0x13a   : > { %v508_v36 = vadd.f32 %v1528_v44, %v1604_v49  ;;  %v520_v44 = vadd.f32 %v1534_v52, %v1604_v49  ;;  %v532_v52 = vadd.f32 %v1544_v62, %v1604_v49  ;;  %v544_v62 = vadd.f32 %v1552_v13, %v1604_v49 }
 0x13b   : > { %v665_v14 = vmax.f32 %v590_v9, 0.0  ;;  %v556_v13 = vadd.f32 %v1560_v26, %v1604_v49  ;;  %v568_v26 = vadd.f32 %v1568_v39, %v1604_v49  ;;  %v580_v39 = vadd.f32 %v1576_v53, %v1604_v49 }
 0x13d   : > { %1201 = vmatmul.mubr.f32.gmra.mxu1 %v665_v14 }
 0x13e   : > { %1203 = vmatprep.mubr.f32.mxu1 %v666_v15 }
 0x141   : > { %1204 = vmatmul.mubr.f32.gmra.mxu1 %v667_v22 }
 0x142   : > { %1206 = vmatprep.mubr.f32.mxu1 %v668_v27 }
 0x145   : > { %1207 = vmatmul.mubr.f32.gmra.mxu1 %v669_v1 }
 0x146   : > { %1209 = vmatprep.mubr.f32.mxu1 %v670_v35 }
 0x149   : > { %1210 = vmatmul.mubr.f32.gmra.mxu1 %v671_v30 }
 0x14a   : > { %1212 = vmatprep.mubr.f32.mxu1 %v672_v41 }
 0x14d   : > { %1213 = vmatmul.mubr.f32.gmra.mxu1 %v673_v42 }
 0x1a5   : > { %v1169_v6 = vpop.f32.mrf.mxu1 }
 0x1a6   : > { %v769_v54 = vadd.f32 %v1169_v6, %v1601_v47 }
 0x1a7   : > { %v763_v2 = vpop.f32.mrf.mxu1 }
 0x1a8   : > { %v923_v56 = vadd.f32 %v769_v54, %v460_v51  ;;  %v764_v12 = vadd.f32 %v1601_v47, %v763_v2 }
 0x1aa   : > { %956 = vst.msk [vmem:[%s1614_s28 + $0x8] sm:$0xff] %vm954_vm1, %v923_v56  ;;  %v922_v58 = vadd.f32 %v764_v12, %v454_v5 }
 0x1ac   : > { %955 = vst.msk [vmem:[%s1614_s28] sm:$0xff] %vm954_vm1, %v922_v58 }
 0x1ad   : > { %v1172_v59 = vpop.f32.mrf.mxu1 }
 0x1ae   : > { %v779_v0 = vadd.f32 %v1172_v59, %v1601_v47 }
 0x1af   : > { %v773_v3 = vpop.f32.mrf.mxu1 }
 0x1b0   : > { %v925_v9 = vadd.f32 %v779_v0, %v472_v63  ;;  %v774_v11 = vadd.f32 %v1601_v47, %v773_v3 }
 0x1b2   : > { %958 = vst.msk [vmem:[%s1614_s28 + $0x18] sm:$0xff] %vm954_vm1, %v925_v9  ;;  %v924_v14 = vadd.f32 %v774_v11, %v466_v4 }
 0x1b4   : > { %957 = vst.msk [vmem:[%s1614_s28 + $0x10] sm:$0xff] %vm954_vm1, %v924_v14 }
 0x1b5   : > { %v1175_v15 = vpop.f32.mrf.mxu1 }
 0x1b6   : > { %v789_v18 = vadd.f32 %v1175_v15, %v1601_v47 }
 0x1b7   : > { %v783_v21 = vpop.f32.mrf.mxu1 }
 0x1b8   : > { %v927_v22 = vadd.f32 %v789_v18, %v484_v20  ;;  %v784_v25 = vadd.f32 %v1601_v47, %v783_v21 }
 0x1ba   : > { %960 = vst.msk [vmem:[%s1614_s28 + $0x28] sm:$0xff] %vm954_vm1, %v927_v22  ;;  %v926_v27 = vadd.f32 %v784_v25, %v478_v16 }
 0x1bc   : > { %959 = vst.msk [vmem:[%s1614_s28 + $0x20] sm:$0xff] %vm954_vm1, %v926_v27 }
 0x1bd   : > { %v1178_v55 = vpop.f32.mrf.mxu1 }
 0x1be   : > { %v799_v31 = vadd.f32 %v1178_v55, %v1601_v47 }
 0x1bf   : > { %v793_v1 = vpop.f32.mrf.mxu1 }
 0x1c0   : > { %v929_v34 = vadd.f32 %v799_v31, %v496_v28  ;;  %v794_v35 = vadd.f32 %v1601_v47, %v793_v1 }
 0x1c2   : > { %962 = vst.msk [vmem:[%s1614_s28 + $0x38] sm:$0xff] %vm954_vm1, %v929_v34  ;;  %v928_v17 = vadd.f32 %v794_v35, %v490_v24  ;;  %v562_v24 = vadd.f32 %v1563_v33, %v1604_v49 }
 0x1c4   : > { %961 = vst.msk [vmem:[%s1614_s28 + $0x30] sm:$0xff] %vm954_vm1, %v928_v17 }
 0x1c5   : > { %v1181_v38 = vpop.f32.mrf.mxu1 }
 0x1c6   : > { %v809_v41 = vadd.f32 %v1181_v38, %v1601_v47 }
 0x1c7   : > { %v803_v30 = vpop.f32.mrf.mxu1 }
 0x1c8   : > { %v931_v42 = vadd.f32 %v809_v41, %v508_v36  ;;  %v804_v43 = vadd.f32 %v1601_v47, %v803_v30  ;;  %v574_v41 = vadd.f32 %v1571_v46, %v1604_v49  ;;  %v586_v46 = vadd.f32 %v1579_v61, %v1604_v49 }
 0x1ca   : > { %964 = vst.msk [vmem:[%s1614_s28 + $0x48] sm:$0xff] %vm954_vm1, %v931_v42  ;;  %v930_v6 = vadd.f32 %v804_v43, %v502_v32  ;;  %v591_v42 = vpop.f32.mrf.mxu0 }
 0x1cb   : > { %v592_v53 = vadd.f32 %v591_v42, %v1604_v49 }
 0x1cc   : > { %963 = vst.msk [vmem:[%s1614_s28 + $0x40] sm:$0xff] %vm954_vm1, %v930_v6 }
 0x1cd   : > { %v1184_v51 = vpop.f32.mrf.mxu1 }
 0x1ce   : > { %v819_v54 = vadd.f32 %v1184_v51, %v1601_v47 }
 0x1cf   : > { %v813_v2 = vpop.f32.mrf.mxu1 }
 0x1d0   : > { %v933_v5 = vadd.f32 %v819_v54, %v520_v44  ;;  %v814_v56 = vadd.f32 %v1601_v47, %v813_v2 }
 0x1d2   : > { %966 = vst.msk [vmem:[%s1614_s28 + $0x58] sm:$0xff] %vm954_vm1, %v933_v5  ;;  %v932_v12 = vadd.f32 %v814_v56, %v514_v40  ;;  %v604_v40 = vadd.f32 %v1549_v10, %v1604_v49  ;;  %v616_v10 = vadd.f32 %v1565_v37, %v1604_v49  ;;  %v628_v37 = vadd.f32 %v1583_v8, %v1604_v49 }
 0x1d3   : > { %v640_v8 = vadd.f32 %v1596_v45, %v1604_v49 }
 0x1d4   : > { %965 = vst.msk [vmem:[%s1614_s28 + $0x50] sm:$0xff] %vm954_vm1, %v932_v12 }
 0x1d5   : > { %v1187_v58 = vpop.f32.mrf.mxu1 }
 0x1d6   : > { %v829_v59 = vadd.f32 %v1187_v58, %v1601_v47  ;;  %v598_v58 = vadd.f32 %v1541_v60, %v1604_v49  ;;  %v610_v60 = vadd.f32 %v1557_v23, %v1604_v49  ;;  %v622_v23 = vadd.f32 %v1573_v50, %v1604_v49 }
 0x1d7   : > { %v823_v63 = vpop.f32.mrf.mxu1 }
 0x1d8   : > { %v935_v0 = vadd.f32 %v829_v59, %v532_v52  ;;  %v824_v3 = vadd.f32 %v1601_v47, %v823_v63 }
 0x1da   : > { %968 = vst.msk [vmem:[%s1614_s28 + $0x68] sm:$0xff] %vm954_vm1, %v935_v0  ;;  %v934_v4 = vadd.f32 %v824_v3, %v526_v48 }
 0x1dc   : > { %967 = vst.msk [vmem:[%s1614_s28 + $0x60] sm:$0xff] %vm954_vm1, %v934_v4 }
 0x1dd   : > { %v1190_v9 = vpop.f32.mrf.mxu1 }
 0x1de   : > { %v839_v11 = vadd.f32 %v1190_v9, %v1601_v47 }
 0x1df   : > { %v833_v14 = vpop.f32.mrf.mxu1 }
 0x1e0   : > { %v937_v15 = vadd.f32 %v839_v11, %v544_v62  ;;  %v834_v20 = vadd.f32 %v1601_v47, %v833_v14 }
 0x1e2   : > { %970 = vst.msk [vmem:[%s1614_s28 + $0x78] sm:$0xff] %vm954_vm1, %v937_v15  ;;  %v936_v18 = vadd.f32 %v834_v20, %v538_v57 }
 0x1e4   : > { %969 = vst.msk [vmem:[%s1614_s28 + $0x70] sm:$0xff] %vm954_vm1, %v936_v18 }
 0x1e5   : > { %v1193_v21 = vpop.f32.mrf.mxu1 }
 0x1e6   : > { %v849_v16 = vadd.f32 %v1193_v21, %v1601_v47 }
 0x1e7   : > { %v843_v22 = vpop.f32.mrf.mxu1 }
 0x1e8   : > { %v939_v25 = vadd.f32 %v849_v16, %v556_v13  ;;  %v844_v27 = vadd.f32 %v1601_v47, %v843_v22  ;;  %v634_v16 = vadd.f32 %v1590_v29, %v1604_v49 }
 0x1ea   : > { %972 = vst.msk [vmem:[%s1614_s28 + $0x88] sm:$0xff] %vm954_vm1, %v939_v25  ;;  %v938_v55 = vadd.f32 %v844_v27, %v550_v7 }
 0x1ec   : > { %971 = vst.msk [vmem:[%s1614_s28 + $0x80] sm:$0xff] %vm954_vm1, %v938_v55 }
 0x1ed   : > { %v1196_v28 = vpop.f32.mrf.mxu1 }
 0x1ee   : > { %v859_v31 = vadd.f32 %v1196_v28, %v1601_v47 }
 0x1ef   : > { %v853_v1 = vpop.f32.mrf.mxu1 }
 0x1f0   : > { %v941_v19 = vadd.f32 %v859_v31, %v568_v26  ;;  %v854_v34 = vadd.f32 %v1601_v47, %v853_v1 }
 0x1f2   : > { %974 = vst.msk [vmem:[%s1614_s28 + $0x98] sm:$0xff] %vm954_vm1, %v941_v19  ;;  %v940_v35 = vadd.f32 %v854_v34, %v562_v24 }
 0x1f4   : > { %973 = vst.msk [vmem:[%s1614_s28 + $0x90] sm:$0xff] %vm954_vm1, %v940_v35 }
 0x1f5   : > { %v1199_v17 = vpop.f32.mrf.mxu1 }
 0x1f6   : > { %v869_v38 = vadd.f32 %v1199_v17, %v1601_v47 }
 0x1f7   : > { %v863_v36 = vpop.f32.mrf.mxu1 }
 0x1f8   : > { %v943_v33 = vadd.f32 %v869_v38, %v580_v39  ;;  %v864_v30 = vadd.f32 %v1601_v47, %v863_v36 }
 0x1fa   : > { %976 = vst.msk [vmem:[%s1614_s28 + $0xa8] sm:$0xff] %vm954_vm1, %v943_v33  ;;  %v942_v32 = vadd.f32 %v864_v30, %v574_v41 }
 0x1fc   : > { %975 = vst.msk [vmem:[%s1614_s28 + $0xa0] sm:$0xff] %vm954_vm1, %v942_v32 }
 0x1fd   : > { %v1202_v43 = vpop.f32.mrf.mxu1 }
 0x1fe   : > { %v879_v6 = vadd.f32 %v1202_v43, %v1601_v47 }
 0x1ff   : > { %v873_v51 = vpop.f32.mrf.mxu1 }
 0x200   : > { %v945_v44 = vadd.f32 %v879_v6, %v592_v53  ;;  %v874_v54 = vadd.f32 %v1601_v47, %v873_v51 }
 0x201   : > { %v1205_v2 = vpop.f32.mrf.mxu1 }
 0x202   : > { %978 = vst.msk [vmem:[%s1614_s28 + $0xb8] sm:$0xff] %vm954_vm1, %v945_v44  ;;  %v944_v5 = vadd.f32 %v874_v54, %v586_v46  ;;  %v889_v56 = vadd.f32 %v1205_v2, %v1601_v47 }
 0x203   : > { %v883_v12 = vpop.f32.mrf.mxu1 }
 0x204   : > { %977 = vst.msk [vmem:[%s1614_s28 + $0xb0] sm:$0xff] %vm954_vm1, %v944_v5  ;;  %v947_v61 = vadd.f32 %v889_v56, %v604_v40  ;;  %v884_v52 = vadd.f32 %v1601_v47, %v883_v12 }
 0x205   : > { %v1208_v59 = vpop.f32.mrf.mxu1 }
 0x206   : > { %980 = vst.msk [vmem:[%s1614_s28 + $0xc8] sm:$0xff] %vm954_vm1, %v947_v61  ;;  %v946_v63 = vadd.f32 %v884_v52, %v598_v58  ;;  %v899_v48 = vadd.f32 %v1208_v59, %v1601_v47 }
 0x207   : > { %v893_v0 = vpop.f32.mrf.mxu1 }
 0x208   : > { %979 = vst.msk [vmem:[%s1614_s28 + $0xc0] sm:$0xff] %vm954_vm1, %v946_v63  ;;  %v949_v3 = vadd.f32 %v899_v48, %v616_v10  ;;  %v894_v4 = vadd.f32 %v1601_v47, %v893_v0 }
 0x209   : > { %v1211_v9 = vpop.f32.mrf.mxu1 }
 0x20a   : > { %982 = vst.msk [vmem:[%s1614_s28 + $0xd8] sm:$0xff] %vm954_vm1, %v949_v3  ;;  %v948_v62 = vadd.f32 %v894_v4, %v610_v60  ;;  %v909_v11 = vadd.f32 %v1211_v9, %v1601_v47 }
 0x20b   : > { %v903_v14 = vpop.f32.mrf.mxu1 }
 0x20c   : > { %981 = vst.msk [vmem:[%s1614_s28 + $0xd0] sm:$0xff] %vm954_vm1, %v948_v62  ;;  %v951_v57 = vadd.f32 %v909_v11, %v628_v37  ;;  %v904_v15 = vadd.f32 %v1601_v47, %v903_v14 }
 0x20d   : > { %v1214_v20 = vpop.f32.mrf.mxu1 }
 0x20e   : > { %984 = vst.msk [vmem:[%s1614_s28 + $0xe8] sm:$0xff] %vm954_vm1, %v951_v57  ;;  %v950_v18 = vadd.f32 %v904_v15, %v622_v23  ;;  %v919_v21 = vadd.f32 %v1214_v20, %v1601_v47 }
 0x20f   : > { %v913_v13 = vpop.f32.mrf.mxu1 }
 0x210   : > { %983 = vst.msk [vmem:[%s1614_s28 + $0xe0] sm:$0xff] %vm954_vm1, %v950_v18  ;;  %v953_v50 = vadd.f32 %v919_v21, %v640_v8  ;;  %v914_v22 = vadd.f32 %v1601_v47, %v913_v13 }
 0x212   : > { %986 = vst.msk [vmem:[%s1614_s28 + $0xf8] sm:$0xff] %vm954_vm1, %v953_v50  ;;  %v952_v7 = vadd.f32 %v914_v22, %v634_v16 }
 0x214   : > { %985 = vst.msk [vmem:[%s1614_s28 + $0xf0] sm:$0xff] %vm954_vm1, %v952_v7 }
 0x215 PF: > { %s15_s18 = sadd.s32 1, %s1246_s18  }
 0x216   : > { %p12_p4 = scmp.ge.s32.totalorder %s15_s18, 4  }
 0x218   :  { %14 = sbr.rel (!%p12_p4) target bundleno = 1 (0x1), region = 70 }

</bundles_post_ra>
